<compile_context>
chip_gen: v7x
topology: tpu7x:2x2x1
jax: 0.10.0
libtpu: 0.0.40
codegen_flags: <defaults>
</compile_context>

<pallas_src>
import functools
import math

import jax
import jax.numpy as jnp
from jax.experimental import pallas as pl
from jax.experimental.pallas import tpu as pltpu

EPS = 1e-5


def _shift_lanes(h, d):
    """out[:, j] = h[:, j + d], zero-filled at the tile edges (|d| <= 2).

    Plain slice + concat so it lowers on every backend / interpret mode; on Mosaic-only builds
    pltpu.roll(h, shift=(-d) % T, axis=1) is the XLU-slot equivalent.
    """
    if d == 0:
        return h
    z = jnp.zeros((h.shape[0], abs(d)), h.dtype)
    if d > 0:
        return jnp.concatenate([h[:, d:], z], axis=1)
    return jnp.concatenate([z, h[:, :d]], axis=1)


def inception_paths_kernel(x_ref, mask_ref, wA_ref, bA_ref, w2b_ref, b2b_ref,
                           w3b_ref, b3b_ref, w4_ref, b4_ref,
                           y_ref, stats_ref, *, F, L, mxu_dtype):
    T = x_ref.shape[1]
    x = x_ref[...]                 # (C, T) f32, batch folded into lanes
    mask_col = mask_ref[...]       # (T, 1) f32, 1.0 on real (batch, position) lanes

    # Position within each length-L segment.  T % L == 0 -> no tile offset / halo needed.
    pos = jax.lax.broadcasted_iota(jnp.int32, (1, T), 1) % L
    # Hoisted tap masks shared by conv3x3 / conv5x5 / maxpool.  The segment masks already
    # exclude every cross-segment / padded contribution for valid output lanes.
    tap_ok = {d: (pos + d >= 0) & (pos + d < L) for d in (-2, -1, 1, 2)}

    def emit(path, idx):
        """Write one pre-BN path and its per-channel (sum, sumsq) immediately."""
        y_ref[idx * F:(idx + 1) * F, :] = path                       # lane-dense store
        # MXU reduction over valid lanes: [path; path^2] @ mask_col -> (2F, 1).
        m = jnp.dot(jnp.concatenate([path, path * path], axis=0), mask_col,
                    preferred_element_type=jnp.float32)
        stats_ref[0, idx * F:(idx + 1) * F, 0:1] = m[0:F]
        stats_ref[0, idx * F:(idx + 1) * F, 1:2] = m[F:2 * F]

    # ---- stage 1: the three 1x1 convs reading x, fused into ONE (3F, C) x (C, T) matmul ----
    xm = x.astype(mxu_dtype)
    hA = jnp.dot(wA_ref[...], xm, preferred_element_type=jnp.float32) + bA_ref[...]
    hA = jax.nn.relu(hA)           # (3F, T) f32
    emit(hA[0:F], 0)               # path1

    def conv_same(h, w_ref, b_ref, K):
        """'same'-padded K-tap conv along the folded lane axis."""
        P = (K - 1) // 2
        taps = []
        for k in range(K):
            d = k - P
            hs = _shift_lanes(h, d)
            if d != 0:
                hs = jnp.where(tap_ok[d], hs, 0.0)
            taps.append(hs.astype(mxu_dtype))
        w = w_ref[...]
        if F >= 128:
            # Large F: accumulated per-tap matmuls; skips the (K*F, T) im2col temporary.
            out = jnp.dot(w[:, 0:F], taps[0], preferred_element_type=jnp.float32)
            for k in range(1, K):
                out = out + jnp.dot(w[:, k * F:(k + 1) * F], taps[k],
                                    preferred_element_type=jnp.float32)
            return out + b_ref[...]
        rhs = jnp.concatenate(taps, axis=0)                          # (K*F, T)
        return jnp.dot(w, rhs, preferred_element_type=jnp.float32) + b_ref[...]

    emit(jax.nn.relu(conv_same(hA[F:2 * F], w2b_ref, b2b_ref, 3)), 1)      # path2
    emit(jax.nn.relu(conv_same(hA[2 * F:3 * F], w3b_ref, b3b_ref, 5)), 2)  # path3

    # ---- path4: maxpool(k=3, s=1, p=1) on x, then 1x1 conv ----
    pooled = x                                    # center tap is always unmasked -> finite
    for d in (-1, 1):
        pooled = jnp.maximum(pooled, jnp.where(tap_ok[d], _shift_lanes(x, d), -jnp.inf))
    p4 = jnp.dot(w4_ref[...], pooled.astype(mxu_dtype),
                 preferred_element_type=jnp.float32) + b4_ref[...]
    emit(jax.nn.relu(p4), 3)


def bn_apply_kernel(y_ref, scale_ref, shift_ref, o_ref):
    o_ref[...] = y_ref[...] * scale_ref[...] + shift_ref[...]


@functools.partial(jax.jit, static_argnames=("lane_tile", "mxu_dtype"))
def inception_block(x, params, *, lane_tile=None, mxu_dtype=jnp.float32):
    N, C, L = x.shape
    F = params["w1"].shape[0]
    NL = N * L

    # Lane tile: a multiple of 128 (lane-dense, unmasked stores) and of L (segment aligned,
    # so the shifted-tap trick never crosses a tile boundary).
    seg = (L * 128) // math.gcd(L, 128)            # lcm(L, 128)
    if lane_tile is None:
        lane_tile = max(seg, (2048 // seg) * seg)  # ~2048-lane tiles by default
    assert lane_tile % seg == 0, "lane_tile must be a multiple of lcm(L, 128)"
    T = min(lane_tile, pl.cdiv(NL, seg) * seg)     # don't tile wider than the padded problem
    LP = pl.cdiv(NL, T) * T
    num_tiles = LP // T
    # Per-tile f32 live set ~ 4*T*(2C + ~14F) bytes (x, hA, widest im2col, pooled, path, out);
    # with the default T this is far under the 32 MiB scoped-VMEM default (and v7x's 64 MiB
    # physical VMEM).  Shrink lane_tile (or pass bf16 mxu_dtype) for very large C / F.

    # Fold batch into lanes, pad to the tile grid; valid-lane column for the MXU BN reductions.
    x2 = jnp.transpose(x, (1, 0, 2)).reshape(C, NL)
    x2 = jnp.pad(x2, ((0, 0), (0, LP - NL)))
    mask_col = (jnp.arange(LP, dtype=jnp.int32) < NL).astype(jnp.float32)[:, None]

    # Stack the three x-consuming 1x1 convs into one weight; flatten K-tap conv weights to
    # (F, K*F) matching the im2col row order k*F + f_in.  Matmul operands cast to mxu_dtype.
    # (For best slice/store alignment keep F a multiple of 8; F=8 here already is.)
    wA = jnp.concatenate([params["w1"], params["w2a"], params["w3a"]], axis=0).astype(mxu_dtype)
    bA = jnp.concatenate([params["b1"], params["b2a"], params["b3a"]], axis=0)
    w2b = jnp.transpose(params["w2b"], (1, 0, 2)).reshape(F, 3 * F).astype(mxu_dtype)
    w3b = jnp.transpose(params["w3b"], (1, 0, 2)).reshape(F, 5 * F).astype(mxu_dtype)
    w4 = params["w4"].astype(mxu_dtype)

    const = lambda i: (0, 0)
    kernel1 = functools.partial(inception_paths_kernel, F=F, L=L, mxu_dtype=mxu_dtype)
    y_pre, stats = pl.pallas_call(
        kernel1,
        grid=(num_tiles,),
        in_specs=[
            pl.BlockSpec((C, T), lambda i: (0, i)),            # x lane tile (pipelined)
            pl.BlockSpec((T, 1), lambda i: (i, 0)),            # valid-lane column
            pl.BlockSpec((3 * F, C), const),                   # resident weights / biases
            pl.BlockSpec((3 * F, 1), const),
            pl.BlockSpec((F, 3 * F), const),
            pl.BlockSpec((F, 1), const),
            pl.BlockSpec((F, 5 * F), const),
            pl.BlockSpec((F, 1), const),
            pl.BlockSpec((F, C), const),
            pl.BlockSpec((F, 1), const),
        ],
        out_specs=(
            pl.BlockSpec((4 * F, T), lambda i: (0, i)),        # pre-BN paths (lane-dense)
            pl.BlockSpec((1, 4 * F, 2), lambda i: (i, 0, 0)),  # per-tile (sum, sumsq)
        ),
        out_shape=(
            jax.ShapeDtypeStruct((4 * F, LP), jnp.float32),
            jax.ShapeDtypeStruct((num_tiles, 4 * F, 2), jnp.float32),
        ),
        compiler_params=pltpu.CompilerParams(dimension_semantics=("parallel",)),
    )(x2, mask_col, wA, bA, w2b, params["b2b"], w3b, params["b3b"], w4, params["b4"])

    # Tiny global reduction + BN folding (4F channels) in plain JAX.
    tot = jnp.sum(stats, axis=0)                               # (4F, 2)
    mean = tot[:, 0:1] / NL
    var = jnp.maximum(tot[:, 1:2] / NL - mean * mean, 0.0)     # guard f32 cancellation
    scale = params["gamma"] * jax.lax.rsqrt(var + EPS)
    shift = params["beta"] - mean * scale

    out2d = pl.pallas_call(
        bn_apply_kernel,
        grid=(num_tiles,),
        in_specs=[
            pl.BlockSpec((4 * F, T), lambda i: (0, i)),
            pl.BlockSpec((4 * F, 1), const),
            pl.BlockSpec((4 * F, 1), const),
        ],
        out_specs=pl.BlockSpec((4 * F, T), lambda i: (0, i)),
        out_shape=jax.ShapeDtypeStruct((4 * F, LP), jnp.float32),
        compiler_params=pltpu.CompilerParams(dimension_semantics=("parallel",)),
    )(y_pre, scale, shift)

    # Unfold: (4F, N*L) -> (N, 4F, L)  (wrapper-side layout plumbing only).
    out = out2d[:, :NL].reshape(4 * F, N, L)
    return jnp.transpose(out, (1, 0, 2))


# -------------------- deterministic parameter construction --------------------

def _uniform(key, shape, fan_in):
    bound = float(fan_in) ** -0.5
    return jax.random.uniform(key, shape, jnp.float32, -bound, bound)


def make_params(key, filters, input_channels):
    F, C = filters, input_channels
    keys = jax.random.split(key, 12)
    return {
        # conv1x1
        "w1": _uniform(keys[0], (F, C), C),
        "b1": _uniform(keys[1], (F, 1), C),
        # conv1x1_3x3 and conv3x3 (taps stored as (K, F_out, F_in))
        "w2a": _uniform(keys[2], (F, C), C),
        "b2a": _uniform(keys[3], (F, 1), C),
        "w2b": _uniform(keys[4], (3, F, F), F * 3),
        "b2b": _uniform(keys[5], (F, 1), F * 3),
        # conv1x1_5x5 and conv5x5
        "w3a": _uniform(keys[6], (F, C), C),
        "b3a": _uniform(keys[7], (F, 1), C),
        "w3b": _uniform(keys[8], (5, F, F), F * 5),
        "b3b": _uniform(keys[9], (F, 1), F * 5),
        # pool_proj
        "w4": _uniform(keys[10], (F, C), C),
        "b4": _uniform(keys[11], (F, 1), C),
        # BatchNorm1d(4F), fresh module: gamma=1, beta=0
        "gamma": jnp.ones((4 * F, 1), jnp.float32),
        "beta": jnp.zeros((4 * F, 1), jnp.float32),
    }


# -------------------- plain-JAX reference (sanity check) --------------------

def reference(x, p):
    N, C, L = x.shape

    def c1(w, b, xin):
        return jnp.einsum("fc,ncl->nfl", w, xin) + b[None, :, :]

    def cK(wk, b, h, K):
        P = (K - 1) // 2
        hp = jnp.pad(h, ((0, 0), (0, 0), (P, P)))
        out = sum(jnp.einsum("fc,ncl->nfl", wk[k], hp[:, :, k:k + L]) for k in range(K))
        return out + b[None, :, :]

    relu = jax.nn.relu
    p1 = relu(c1(p["w1"], p["b1"], x))
    p2 = relu(cK(p["w2b"], p["b2b"], relu(c1(p["w2a"], p["b2a"], x)), 3))
    p3 = relu(cK(p["w3b"], p["b3b"], relu(c1(p["w3a"], p["b3a"], x)), 5))
    xp = jnp.pad(x, ((0, 0), (0, 0), (1, 1)), constant_values=-jnp.inf)
    pooled = jnp.maximum(jnp.maximum(xp[:, :, 0:L], xp[:, :, 1:L + 1]), xp[:, :, 2:L + 2])
    p4 = relu(c1(p["w4"], p["b4"], pooled))
    y = jnp.concatenate([p1, p2, p3, p4], axis=1)
    mean = jnp.mean(y, axis=(0, 2), keepdims=True)
    var = jnp.mean((y - mean) ** 2, axis=(0, 2), keepdims=True)
    yhat = (y - mean) * jax.lax.rsqrt(var + EPS)
    return p["gamma"][None] * yhat + p["beta"][None]


if __name__ == "__main__":
    key = jax.random.PRNGKey(0)
    k_x, k_p = jax.random.split(key)

    batch, input_channels, length, filters = 2, 21, 16, 8
    x = jax.random.normal(k_x, (batch, input_channels, length), jnp.float32)
    params = make_params(k_p, filters, input_channels)

    ref = reference(x, params)

    # f32 MXU path: exact check against the plain-JAX reference.
    out = jax.block_until_ready(inception_block(x, params))
    assert out.shape == (batch, 4 * filters, length)
    assert jnp.allclose(out, ref, rtol=1e-4, atol=1e-4), "kernel/reference mismatch (f32)"

    # bf16-at-the-MXU-boundary path (v6e/v7x throughput + VMEM saving); loose tolerance.
    out_bf16 = jax.block_until_ready(inception_block(x, params, mxu_dtype=jnp.bfloat16))
    assert jnp.all(jnp.isfinite(out_bf16))
    assert float(jnp.max(jnp.abs(out_bf16 - ref))) < 0.25, "kernel/reference mismatch (bf16)"

    print("KERNEL_OK")
</pallas_src>

<mosaic_0001>
module attributes {stable_mosaic.version = 11 : i64} {
  func.func @bn_apply_kernel(%arg0: i32, %arg1: memref<32x128xf32, #tpu.memory_space<vmem>>, %arg2: memref<32x1xf32, #tpu.memory_space<vmem>>, %arg3: memref<32x1xf32, #tpu.memory_space<vmem>>, %arg4: memref<32x128xf32, #tpu.memory_space<vmem>>) attributes {dimension_semantics = [#tpu.dimension_semantics<parallel>], iteration_bounds = array<i64: 1>, scalar_prefetch = 0 : i64, scratch_operands = 0 : i64, tpu.core_type = #tpu.core_type<tc>, window_params = [{transform_indices = @transform_0, window_bounds = array<i64: 32, 128>}, {pipeline_mode = #tpu.pipeline_mode<synchronous>, transform_indices = @transform_1, window_bounds = array<i64: 32, 1>}, {pipeline_mode = #tpu.pipeline_mode<synchronous>, transform_indices = @transform_2, window_bounds = array<i64: 32, 1>}, {transform_indices = @transform_3, window_bounds = array<i64: 32, 128>}]} {
    %c0 = arith.constant 0 : index
    %c0_0 = arith.constant 0 : index
    %0 = vector.load %arg1[%c0, %c0_0] : memref<32x128xf32, #tpu.memory_space<vmem>>, vector<32x128xf32>
    %c0_1 = arith.constant 0 : index
    %c0_2 = arith.constant 0 : index
    %1 = vector.load %arg2[%c0_1, %c0_2] : memref<32x1xf32, #tpu.memory_space<vmem>>, vector<32x1xf32>
    %2 = vector.broadcast %1 : vector<32x1xf32> to vector<32x128xf32>
    %3 = arith.mulf %0, %2 : vector<32x128xf32>
    %c0_3 = arith.constant 0 : index
    %c0_4 = arith.constant 0 : index
    %4 = vector.load %arg3[%c0_3, %c0_4] : memref<32x1xf32, #tpu.memory_space<vmem>>, vector<32x1xf32>
    %5 = vector.broadcast %4 : vector<32x1xf32> to vector<32x128xf32>
    %6 = arith.addf %3, %5 : vector<32x128xf32>
    %c0_5 = arith.constant 0 : index
    %c0_6 = arith.constant 0 : index
    %7 = vector.load %arg4[%c0_5, %c0_6] : memref<32x128xf32, #tpu.memory_space<vmem>>, vector<32x128xf32>
    tpu.vector_store %arg4[%c0_5, %c0_6], %6 {strides = array<i32>} : memref<32x128xf32, #tpu.memory_space<vmem>>, vector<32x128xf32>,
    return
  }
  func.func @transform_0(%arg0: i32) -> (i32, i32) {
    %c0_i32 = arith.constant 0 : i32
    %c0_i32_0 = arith.constant 0 : i32
    return %c0_i32, %arg0 : i32, i32
  }
  func.func @transform_1(%arg0: i32) -> (i32, i32) {
    %c0_i32 = arith.constant 0 : i32
    %c0_i32_0 = arith.constant 0 : i32
    %c0_i32_1 = arith.constant 0 : i32
    return %c0_i32, %c0_i32_0 : i32, i32
  }
  func.func @transform_2(%arg0: i32) -> (i32, i32) {
    %c0_i32 = arith.constant 0 : i32
    %c0_i32_0 = arith.constant 0 : i32
    %c0_i32_1 = arith.constant 0 : i32
    return %c0_i32, %c0_i32_0 : i32, i32
  }
  func.func @transform_3(%arg0: i32) -> (i32, i32) {
    %c0_i32 = arith.constant 0 : i32
    %c0_i32_0 = arith.constant 0 : i32
    return %c0_i32, %arg0 : i32, i32
  }
}

module attributes {stable_mosaic.version = 11 : i64} {
  func.func @inception_paths_kernel(%arg0: i32, %arg1: memref<21x128xf32, #tpu.memory_space<vmem>>, %arg2: memref<128x1xf32, #tpu.memory_space<vmem>>, %arg3: memref<24x21xf32, #tpu.memory_space<vmem>>, %arg4: memref<24x1xf32, #tpu.memory_space<vmem>>, %arg5: memref<8x24xf32, #tpu.memory_space<vmem>>, %arg6: memref<8x1xf32, #tpu.memory_space<vmem>>, %arg7: memref<8x40xf32, #tpu.memory_space<vmem>>, %arg8: memref<8x1xf32, #tpu.memory_space<vmem>>, %arg9: memref<8x21xf32, #tpu.memory_space<vmem>>, %arg10: memref<8x1xf32, #tpu.memory_space<vmem>>, %arg11: memref<32x128xf32, #tpu.memory_space<vmem>>, %arg12: memref<1x32x2xf32, #tpu.memory_space<vmem>>) attributes {dimension_semantics = [#tpu.dimension_semantics<parallel>], iteration_bounds = array<i64: 1>, scalar_prefetch = 0 : i64, scratch_operands = 0 : i64, tpu.core_type = #tpu.core_type<tc>, window_params = [{transform_indices = @transform_0, window_bounds = array<i64: 21, 128>}, {transform_indices = @transform_1, window_bounds = array<i64: 128, 1>}, {pipeline_mode = #tpu.pipeline_mode<synchronous>, transform_indices = @transform_2, window_bounds = array<i64: 24, 21>}, {pipeline_mode = #tpu.pipeline_mode<synchronous>, transform_indices = @transform_3, window_bounds = array<i64: 24, 1>}, {pipeline_mode = #tpu.pipeline_mode<synchronous>, transform_indices = @transform_4, window_bounds = array<i64: 8, 24>}, {pipeline_mode = #tpu.pipeline_mode<synchronous>, transform_indices = @transform_5, window_bounds = array<i64: 8, 1>}, {pipeline_mode = #tpu.pipeline_mode<synchronous>, transform_indices = @transform_6, window_bounds = array<i64: 8, 40>}, {pipeline_mode = #tpu.pipeline_mode<synchronous>, transform_indices = @transform_7, window_bounds = array<i64: 8, 1>}, {pipeline_mode = #tpu.pipeline_mode<synchronous>, transform_indices = @transform_8, window_bounds = array<i64: 8, 21>}, {pipeline_mode = #tpu.pipeline_mode<synchronous>, transform_indices = @transform_9, window_bounds = array<i64: 8, 1>}, {transform_indices = @transform_10, window_bounds = array<i64: 32, 128>}, {transform_indices = @transform_11, window_bounds = array<i64: 1, 32, 2>}]} {
    %c0 = arith.constant 0 : index
    %c0_0 = arith.constant 0 : index
    %0 = vector.load %arg1[%c0, %c0_0] : memref<21x128xf32, #tpu.memory_space<vmem>>, vector<21x128xf32>
    %c0_1 = arith.constant 0 : index
    %c0_2 = arith.constant 0 : index
    %1 = vector.load %arg2[%c0_1, %c0_2] : memref<128x1xf32, #tpu.memory_space<vmem>>, vector<128x1xf32>
    %2 = tpu.iota {dimensions = array<i32: 1>} : vector<1x128xi32>
    %c16_i32 = arith.constant 16 : i32
    %c0_i32 = arith.constant 0 : i32
    %3 = arith.cmpi eq, %c16_i32, %c0_i32 : i32
    %c1_i32 = arith.constant 1 : i32
    %4 = arith.select %3, %c1_i32, %c16_i32 : i32
    %5 = vector.broadcast %4 : i32 to vector<1x128xi32>
    %6 = arith.remsi %2, %5 : vector<1x128xi32>
    %c0_i32_3 = arith.constant 0 : i32
    %7 = vector.broadcast %c0_i32_3 : i32 to vector<1x128xi32>
    %8 = arith.cmpi ne, %6, %7 : vector<1x128xi32>
    %c0_i32_4 = arith.constant 0 : i32
    %9 = vector.broadcast %c0_i32_4 : i32 to vector<1x128xi32>
    %10 = arith.cmpi slt, %6, %9 : vector<1x128xi32>
    %c0_i32_5 = arith.constant 0 : i32
    %11 = arith.cmpi slt, %4, %c0_i32_5 : i32
    %12 = vector.broadcast %11 : i1 to vector<1x128xi1>
    %13 = vector.broadcast %12 : vector<1x128xi1> to vector<1x128xi1>
    %14 = arith.xori %10, %13 : vector<1x128xi1>
    %15 = arith.andi %14, %8 : vector<1x128xi1>
    %16 = vector.broadcast %4 : i32 to vector<1x128xi32>
    %17 = arith.addi %6, %16 : vector<1x128xi32>
    %18 = arith.select %15, %17, %6 : vector<1x128xi1>, vector<1x128xi32>
    %c-2_i32 = arith.constant -2 : i32
    %19 = vector.broadcast %c-2_i32 : i32 to vector<1x128xi32>
    %20 = arith.addi %18, %19 : vector<1x128xi32>
    %c0_i32_6 = arith.constant 0 : i32
    %21 = vector.broadcast %c0_i32_6 : i32 to vector<1x128xi32>
    %22 = arith.cmpi sge, %20, %21 : vector<1x128xi32>
    %c-2_i32_7 = arith.constant -2 : i32
    %23 = vector.broadcast %c-2_i32_7 : i32 to vector<1x128xi32>
    %24 = arith.addi %18, %23 : vector<1x128xi32>
    %c16_i32_8 = arith.constant 16 : i32
    %25 = vector.broadcast %c16_i32_8 : i32 to vector<1x128xi32>
    %26 = arith.cmpi slt, %24, %25 : vector<1x128xi32>
    %27 = arith.andi %22, %26 : vector<1x128xi1>
    %c-1_i32 = arith.constant -1 : i32
    %28 = vector.broadcast %c-1_i32 : i32 to vector<1x128xi32>
    %29 = arith.addi %18, %28 : vector<1x128xi32>
    %c0_i32_9 = arith.constant 0 : i32
    %30 = vector.broadcast %c0_i32_9 : i32 to vector<1x128xi32>
    %31 = arith.cmpi sge, %29, %30 : vector<1x128xi32>
    %c-1_i32_10 = arith.constant -1 : i32
    %32 = vector.broadcast %c-1_i32_10 : i32 to vector<1x128xi32>
    %33 = arith.addi %18, %32 : vector<1x128xi32>
    %c16_i32_11 = arith.constant 16 : i32
    %34 = vector.broadcast %c16_i32_11 : i32 to vector<1x128xi32>
    %35 = arith.cmpi slt, %33, %34 : vector<1x128xi32>
    %36 = arith.andi %31, %35 : vector<1x128xi1>
    %c1_i32_12 = arith.constant 1 : i32
    %37 = vector.broadcast %c1_i32_12 : i32 to vector<1x128xi32>
    %38 = arith.addi %18, %37 : vector<1x128xi32>
    %c0_i32_13 = arith.constant 0 : i32
    %39 = vector.broadcast %c0_i32_13 : i32 to vector<1x128xi32>
    %40 = arith.cmpi sge, %38, %39 : vector<1x128xi32>
    %c1_i32_14 = arith.constant 1 : i32
    %41 = vector.broadcast %c1_i32_14 : i32 to vector<1x128xi32>
    %42 = arith.addi %18, %41 : vector<1x128xi32>
    %c16_i32_15 = arith.constant 16 : i32
    %43 = vector.broadcast %c16_i32_15 : i32 to vector<1x128xi32>
    %44 = arith.cmpi slt, %42, %43 : vector<1x128xi32>
    %45 = arith.andi %40, %44 : vector<1x128xi1>
    %c2_i32 = arith.constant 2 : i32
    %46 = vector.broadcast %c2_i32 : i32 to vector<1x128xi32>
    %47 = arith.addi %18, %46 : vector<1x128xi32>
    %c0_i32_16 = arith.constant 0 : i32
    %48 = vector.broadcast %c0_i32_16 : i32 to vector<1x128xi32>
    %49 = arith.cmpi sge, %47, %48 : vector<1x128xi32>
    %c2_i32_17 = arith.constant 2 : i32
    %50 = vector.broadcast %c2_i32_17 : i32 to vector<1x128xi32>
    %51 = arith.addi %18, %50 : vector<1x128xi32>
    %c16_i32_18 = arith.constant 16 : i32
    %52 = vector.broadcast %c16_i32_18 : i32 to vector<1x128xi32>
    %53 = arith.cmpi slt, %51, %52 : vector<1x128xi32>
    %54 = arith.andi %49, %53 : vector<1x128xi1>
    %c0_19 = arith.constant 0 : index
    %c0_20 = arith.constant 0 : index
    %55 = vector.load %arg3[%c0_19, %c0_20] : memref<24x21xf32, #tpu.memory_space<vmem>>, vector<24x21xf32>
    %cst = arith.constant dense<0.000000e+00> : vector<24x128xf32>
    %56 = tpu.matmul %55, %0, %cst {dimension_numbers = #tpu.dot_dimension_numbers<[1], [0], [0], [1], [0, 0, 1, 1], [], []>} : vector<24x21xf32>, vector<21x128xf32>, vector<24x128xf32> -> vector<24x128xf32>
    %c0_21 = arith.constant 0 : index
    %c0_22 = arith.constant 0 : index
    %57 = vector.load %arg4[%c0_21, %c0_22] : memref<24x1xf32, #tpu.memory_space<vmem>>, vector<24x1xf32>
    %58 = vector.broadcast %57 : vector<24x1xf32> to vector<24x128xf32>
    %59 = arith.addf %56, %58 : vector<24x128xf32>
    %cst_23 = arith.constant 0.000000e+00 : f32
    %60 = vector.broadcast %cst_23 : f32 to vector<24x128xf32>
    %61 = arith.maximumf %59, %60 : vector<24x128xf32>
    %62 = vector.extract_strided_slice %61 {offsets = [0, 0], sizes = [8, 128], strides = [1, 1]} : vector<24x128xf32> to vector<8x128xf32>
    %c0_24 = arith.constant 0 : index
    %c0_25 = arith.constant 0 : index
    %63 = vector.load %arg11[%c0_24, %c0_25] : memref<32x128xf32, #tpu.memory_space<vmem>>, vector<8x128xf32>
    tpu.vector_store %arg11[%c0_24, %c0_25], %62 {strides = array<i32>} : memref<32x128xf32, #tpu.memory_space<vmem>>, vector<8x128xf32>,
    %64 = arith.mulf %62, %62 : vector<8x128xf32>
    %65 = tpu.concatenate %62, %64 in 0 : vector<8x128xf32>, vector<8x128xf32> -> vector<16x128xf32>
    %cst_26 = arith.constant dense<0.000000e+00> : vector<16x1xf32>
    %66 = tpu.matmul %65, %1, %cst_26 {dimension_numbers = #tpu.dot_dimension_numbers<[1], [0], [0], [1], [0, 0, 1, 1], [], []>} : vector<16x128xf32>, vector<128x1xf32>, vector<16x1xf32> -> vector<16x1xf32>
    %67 = vector.extract_strided_slice %66 {offsets = [0, 0], sizes = [8, 1], strides = [1, 1]} : vector<16x1xf32> to vector<8x1xf32>
    %c0_27 = arith.constant 0 : index
    %c0_28 = arith.constant 0 : index
    %c0_29 = arith.constant 0 : index
    %68 = vector.load %arg12[%c0_27, %c0_28, %c0_29] : memref<1x32x2xf32, #tpu.memory_space<vmem>>, vector<1x8x1xf32>
    %69 = vector.shape_cast %68 : vector<1x8x1xf32> to vector<8x1xf32>
    %70 = vector.shape_cast %67 : vector<8x1xf32> to vector<1x8x1xf32>
    tpu.vector_store %arg12[%c0_27, %c0_28, %c0_29], %70 {strides = array<i32>} : memref<1x32x2xf32, #tpu.memory_space<vmem>>, vector<1x8x1xf32>,
    %71 = vector.extract_strided_slice %66 {offsets = [8, 0], sizes = [8, 1], strides = [1, 1]} : vector<16x1xf32> to vector<8x1xf32>
    %c0_30 = arith.constant 0 : index
    %c0_31 = arith.constant 0 : index
    %c1 = arith.constant 1 : index
    %72 = vector.load %arg12[%c0_30, %c0_31, %c1] : memref<1x32x2xf32, #tpu.memory_space<vmem>>, vector<1x8x1xf32>
    %73 = vector.shape_cast %72 : vector<1x8x1xf32> to vector<8x1xf32>
    %74 = vector.shape_cast %71 : vector<8x1xf32> to vector<1x8x1xf32>
    tpu.vector_store %arg12[%c0_30, %c0_31, %c1], %74 {strides = array<i32>} : memref<1x32x2xf32, #tpu.memory_space<vmem>>, vector<1x8x1xf32>,
    %75 = vector.extract_strided_slice %61 {offsets = [8, 0], sizes = [8, 128], strides = [1, 1]} : vector<24x128xf32> to vector<8x128xf32>
    %cst_32 = arith.constant 0.000000e+00 : f32
    %76 = vector.broadcast %cst_32 : f32 to vector<8x1xf32>
    %77 = vector.extract_strided_slice %75 {offsets = [0, 0], sizes = [8, 127], strides = [1, 1]} : vector<8x128xf32> to vector<8x127xf32>
    %78 = tpu.concatenate %76, %77 in 1 : vector<8x1xf32>, vector<8x127xf32> -> vector<8x128xf32>
    %cst_33 = arith.constant 0.000000e+00 : f32
    %79 = vector.shape_cast %36 : vector<1x128xi1> to vector<1x128xi1>
    %80 = vector.broadcast %79 : vector<1x128xi1> to vector<8x128xi1>
    %81 = vector.broadcast %cst_33 : f32 to vector<8x128xf32>
    %82 = arith.select %80, %78, %81 : vector<8x128xi1>, vector<8x128xf32>
    %cst_34 = arith.constant 0.000000e+00 : f32
    %83 = vector.broadcast %cst_34 : f32 to vector<8x1xf32>
    %84 = vector.extract_strided_slice %75 {offsets = [0, 1], sizes = [8, 127], strides = [1, 1]} : vector<8x128xf32> to vector<8x127xf32>
    %85 = tpu.concatenate %84, %83 in 1 : vector<8x127xf32>, vector<8x1xf32> -> vector<8x128xf32>
    %cst_35 = arith.constant 0.000000e+00 : f32
    %86 = vector.shape_cast %45 : vector<1x128xi1> to vector<1x128xi1>
    %87 = vector.broadcast %86 : vector<1x128xi1> to vector<8x128xi1>
    %88 = vector.broadcast %cst_35 : f32 to vector<8x128xf32>
    %89 = arith.select %87, %85, %88 : vector<8x128xi1>, vector<8x128xf32>
    %c0_36 = arith.constant 0 : index
    %c0_37 = arith.constant 0 : index
    %90 = vector.load %arg5[%c0_36, %c0_37] : memref<8x24xf32, #tpu.memory_space<vmem>>, vector<8x24xf32>
    %91 = tpu.concatenate %82, %75, %89 in 0 : vector<8x128xf32>, vector<8x128xf32>, vector<8x128xf32> -> vector<24x128xf32>
    %cst_38 = arith.constant dense<0.000000e+00> : vector<8x128xf32>
    %92 = tpu.matmul %90, %91, %cst_38 {dimension_numbers = #tpu.dot_dimension_numbers<[1], [0], [0], [1], [0, 0, 1, 1], [], []>} : vector<8x24xf32>, vector<24x128xf32>, vector<8x128xf32> -> vector<8x128xf32>
    %c0_39 = arith.constant 0 : index
    %c0_40 = arith.constant 0 : index
    %93 = vector.load %arg6[%c0_39, %c0_40] : memref<8x1xf32, #tpu.memory_space<vmem>>, vector<8x1xf32>
    %94 = vector.broadcast %93 : vector<8x1xf32> to vector<8x128xf32>
    %95 = arith.addf %92, %94 : vector<8x128xf32>
    %cst_41 = arith.constant 0.000000e+00 : f32
    %96 = vector.broadcast %cst_41 : f32 to vector<8x128xf32>
    %97 = arith.maximumf %95, %96 : vector<8x128xf32>
    %c8 = arith.constant 8 : index
    %c0_42 = arith.constant 0 : index
    %98 = vector.load %arg11[%c8, %c0_42] : memref<32x128xf32, #tpu.memory_space<vmem>>, vector<8x128xf32>
    tpu.vector_store %arg11[%c8, %c0_42], %97 {strides = array<i32>} : memref<32x128xf32, #tpu.memory_space<vmem>>, vector<8x128xf32>,
    %99 = arith.mulf %97, %97 : vector<8x128xf32>
    %100 = tpu.concatenate %97, %99 in 0 : vector<8x128xf32>, vector<8x128xf32> -> vector<16x128xf32>
    %cst_43 = arith.constant dense<0.000000e+00> : vector<16x1xf32>
    %101 = tpu.matmul %100, %1, %cst_43 {dimension_numbers = #tpu.dot_dimension_numbers<[1], [0], [0], [1], [0, 0, 1, 1], [], []>} : vector<16x128xf32>, vector<128x1xf32>, vector<16x1xf32> -> vector<16x1xf32>
    %102 = vector.extract_strided_slice %101 {offsets = [0, 0], sizes = [8, 1], strides = [1, 1]} : vector<16x1xf32> to vector<8x1xf32>
    %c0_44 = arith.constant 0 : index
    %c8_45 = arith.constant 8 : index
    %c0_46 = arith.constant 0 : index
    %103 = vector.load %arg12[%c0_44, %c8_45, %c0_46] : memref<1x32x2xf32, #tpu.memory_space<vmem>>, vector<1x8x1xf32>
    %104 = vector.shape_cast %103 : vector<1x8x1xf32> to vector<8x1xf32>
    %105 = vector.shape_cast %102 : vector<8x1xf32> to vector<1x8x1xf32>
    tpu.vector_store %arg12[%c0_44, %c8_45, %c0_46], %105 {strides = array<i32>} : memref<1x32x2xf32, #tpu.memory_space<vmem>>, vector<1x8x1xf32>,
    %106 = vector.extract_strided_slice %101 {offsets = [8, 0], sizes = [8, 1], strides = [1, 1]} : vector<16x1xf32> to vector<8x1xf32>
    %c0_47 = arith.constant 0 : index
    %c8_48 = arith.constant 8 : index
    %c1_49 = arith.constant 1 : index
    %107 = vector.load %arg12[%c0_47, %c8_48, %c1_49] : memref<1x32x2xf32, #tpu.memory_space<vmem>>, vector<1x8x1xf32>
    %108 = vector.shape_cast %107 : vector<1x8x1xf32> to vector<8x1xf32>
    %109 = vector.shape_cast %106 : vector<8x1xf32> to vector<1x8x1xf32>
    tpu.vector_store %arg12[%c0_47, %c8_48, %c1_49], %109 {strides = array<i32>} : memref<1x32x2xf32, #tpu.memory_space<vmem>>, vector<1x8x1xf32>,
    %110 = vector.extract_strided_slice %61 {offsets = [16, 0], sizes = [8, 128], strides = [1, 1]} : vector<24x128xf32> to vector<8x128xf32>
    %cst_50 = arith.constant 0.000000e+00 : f32
    %111 = vector.broadcast %cst_50 : f32 to vector<8x2xf32>
    %112 = vector.extract_strided_slice %110 {offsets = [0, 0], sizes = [8, 126], strides = [1, 1]} : vector<8x128xf32> to vector<8x126xf32>
    %113 = tpu.concatenate %111, %112 in 1 : vector<8x2xf32>, vector<8x126xf32> -> vector<8x128xf32>
    %cst_51 = arith.constant 0.000000e+00 : f32
    %114 = vector.shape_cast %27 : vector<1x128xi1> to vector<1x128xi1>
    %115 = vector.broadcast %114 : vector<1x128xi1> to vector<8x128xi1>
    %116 = vector.broadcast %cst_51 : f32 to vector<8x128xf32>
    %117 = arith.select %115, %113, %116 : vector<8x128xi1>, vector<8x128xf32>
    %cst_52 = arith.constant 0.000000e+00 : f32
    %118 = vector.broadcast %cst_52 : f32 to vector<8x1xf32>
    %119 = vector.extract_strided_slice %110 {offsets = [0, 0], sizes = [8, 127], strides = [1, 1]} : vector<8x128xf32> to vector<8x127xf32>
    %120 = tpu.concatenate %118, %119 in 1 : vector<8x1xf32>, vector<8x127xf32> -> vector<8x128xf32>
    %cst_53 = arith.constant 0.000000e+00 : f32
    %121 = vector.shape_cast %36 : vector<1x128xi1> to vector<1x128xi1>
    %122 = vector.broadcast %121 : vector<1x128xi1> to vector<8x128xi1>
    %123 = vector.broadcast %cst_53 : f32 to vector<8x128xf32>
    %124 = arith.select %122, %120, %123 : vector<8x128xi1>, vector<8x128xf32>
    %cst_54 = arith.constant 0.000000e+00 : f32
    %125 = vector.broadcast %cst_54 : f32 to vector<8x1xf32>
    %126 = vector.extract_strided_slice %110 {offsets = [0, 1], sizes = [8, 127], strides = [1, 1]} : vector<8x128xf32> to vector<8x127xf32>
    %127 = tpu.concatenate %126, %125 in 1 : vector<8x127xf32>, vector<8x1xf32> -> vector<8x128xf32>
    %cst_55 = arith.constant 0.000000e+00 : f32
    %128 = vector.shape_cast %45 : vector<1x128xi1> to vector<1x128xi1>
    %129 = vector.broadcast %128 : vector<1x128xi1> to vector<8x128xi1>
    %130 = vector.broadcast %cst_55 : f32 to vector<8x128xf32>
    %131 = arith.select %129, %127, %130 : vector<8x128xi1>, vector<8x128xf32>
    %cst_56 = arith.constant 0.000000e+00 : f32
    %132 = vector.broadcast %cst_56 : f32 to vector<8x2xf32>
    %133 = vector.extract_strided_slice %110 {offsets = [0, 2], sizes = [8, 126], strides = [1, 1]} : vector<8x128xf32> to vector<8x126xf32>
    %134 = tpu.concatenate %133, %132 in 1 : vector<8x126xf32>, vector<8x2xf32> -> vector<8x128xf32>
    %cst_57 = arith.constant 0.000000e+00 : f32
    %135 = vector.shape_cast %54 : vector<1x128xi1> to vector<1x128xi1>
    %136 = vector.broadcast %135 : vector<1x128xi1> to vector<8x128xi1>
    %137 = vector.broadcast %cst_57 : f32 to vector<8x128xf32>
    %138 = arith.select %136, %134, %137 : vector<8x128xi1>, vector<8x128xf32>
    %c0_58 = arith.constant 0 : index
    %c0_59 = arith.constant 0 : index
    %139 = vector.load %arg7[%c0_58, %c0_59] : memref<8x40xf32, #tpu.memory_space<vmem>>, vector<8x40xf32>
    %140 = tpu.concatenate %117, %124, %110, %131, %138 in 0 : vector<8x128xf32>, vector<8x128xf32>, vector<8x128xf32>, vector<8x128xf32>, vector<8x128xf32> -> vector<40x128xf32>
    %cst_60 = arith.constant dense<0.000000e+00> : vector<8x128xf32>
    %141 = tpu.matmul %139, %140, %cst_60 {dimension_numbers = #tpu.dot_dimension_numbers<[1], [0], [0], [1], [0, 0, 1, 1], [], []>} : vector<8x40xf32>, vector<40x128xf32>, vector<8x128xf32> -> vector<8x128xf32>
    %c0_61 = arith.constant 0 : index
    %c0_62 = arith.constant 0 : index
    %142 = vector.load %arg8[%c0_61, %c0_62] : memref<8x1xf32, #tpu.memory_space<vmem>>, vector<8x1xf32>
    %143 = vector.broadcast %142 : vector<8x1xf32> to vector<8x128xf32>
    %144 = arith.addf %141, %143 : vector<8x128xf32>
    %cst_63 = arith.constant 0.000000e+00 : f32
    %145 = vector.broadcast %cst_63 : f32 to vector<8x128xf32>
    %146 = arith.maximumf %144, %145 : vector<8x128xf32>
    %c16 = arith.constant 16 : index
    %c0_64 = arith.constant 0 : index
    %147 = vector.load %arg11[%c16, %c0_64] : memref<32x128xf32, #tpu.memory_space<vmem>>, vector<8x128xf32>
    tpu.vector_store %arg11[%c16, %c0_64], %146 {strides = array<i32>} : memref<32x128xf32, #tpu.memory_space<vmem>>, vector<8x128xf32>,
    %148 = arith.mulf %146, %146 : vector<8x128xf32>
    %149 = tpu.concatenate %146, %148 in 0 : vector<8x128xf32>, vector<8x128xf32> -> vector<16x128xf32>
    %cst_65 = arith.constant dense<0.000000e+00> : vector<16x1xf32>
    %150 = tpu.matmul %149, %1, %cst_65 {dimension_numbers = #tpu.dot_dimension_numbers<[1], [0], [0], [1], [0, 0, 1, 1], [], []>} : vector<16x128xf32>, vector<128x1xf32>, vector<16x1xf32> -> vector<16x1xf32>
    %151 = vector.extract_strided_slice %150 {offsets = [0, 0], sizes = [8, 1], strides = [1, 1]} : vector<16x1xf32> to vector<8x1xf32>
    %c0_66 = arith.constant 0 : index
    %c16_67 = arith.constant 16 : index
    %c0_68 = arith.constant 0 : index
    %152 = vector.load %arg12[%c0_66, %c16_67, %c0_68] : memref<1x32x2xf32, #tpu.memory_space<vmem>>, vector<1x8x1xf32>
    %153 = vector.shape_cast %152 : vector<1x8x1xf32> to vector<8x1xf32>
    %154 = vector.shape_cast %151 : vector<8x1xf32> to vector<1x8x1xf32>
    tpu.vector_store %arg12[%c0_66, %c16_67, %c0_68], %154 {strides = array<i32>} : memref<1x32x2xf32, #tpu.memory_space<vmem>>, vector<1x8x1xf32>,
    %155 = vector.extract_strided_slice %150 {offsets = [8, 0], sizes = [8, 1], strides = [1, 1]} : vector<16x1xf32> to vector<8x1xf32>
    %c0_69 = arith.constant 0 : index
    %c16_70 = arith.constant 16 : index
    %c1_71 = arith.constant 1 : index
    %156 = vector.load %arg12[%c0_69, %c16_70, %c1_71] : memref<1x32x2xf32, #tpu.memory_space<vmem>>, vector<1x8x1xf32>
    %157 = vector.shape_cast %156 : vector<1x8x1xf32> to vector<8x1xf32>
    %158 = vector.shape_cast %155 : vector<8x1xf32> to vector<1x8x1xf32>
    tpu.vector_store %arg12[%c0_69, %c16_70, %c1_71], %158 {strides = array<i32>} : memref<1x32x2xf32, #tpu.memory_space<vmem>>, vector<1x8x1xf32>,
    %cst_72 = arith.constant 0.000000e+00 : f32
    %159 = vector.broadcast %cst_72 : f32 to vector<21x1xf32>
    %160 = vector.extract_strided_slice %0 {offsets = [0, 0], sizes = [21, 127], strides = [1, 1]} : vector<21x128xf32> to vector<21x127xf32>
    %161 = tpu.concatenate %159, %160 in 1 : vector<21x1xf32>, vector<21x127xf32> -> vector<21x128xf32>
    %cst_73 = arith.constant 0xFF800000 : f32
    %162 = vector.shape_cast %36 : vector<1x128xi1> to vector<1x128xi1>
    %163 = vector.broadcast %162 : vector<1x128xi1> to vector<21x128xi1>
    %164 = vector.broadcast %cst_73 : f32 to vector<21x128xf32>
    %165 = arith.select %163, %161, %164 : vector<21x128xi1>, vector<21x128xf32>
    %166 = arith.maximumf %0, %165 : vector<21x128xf32>
    %cst_74 = arith.constant 0.000000e+00 : f32
    %167 = vector.broadcast %cst_74 : f32 to vector<21x1xf32>
    %168 = vector.extract_strided_slice %0 {offsets = [0, 1], sizes = [21, 127], strides = [1, 1]} : vector<21x128xf32> to vector<21x127xf32>
    %169 = tpu.concatenate %168, %167 in 1 : vector<21x127xf32>, vector<21x1xf32> -> vector<21x128xf32>
    %cst_75 = arith.constant 0xFF800000 : f32
    %170 = vector.shape_cast %45 : vector<1x128xi1> to vector<1x128xi1>
    %171 = vector.broadcast %170 : vector<1x128xi1> to vector<21x128xi1>
    %172 = vector.broadcast %cst_75 : f32 to vector<21x128xf32>
    %173 = arith.select %171, %169, %172 : vector<21x128xi1>, vector<21x128xf32>
    %174 = arith.maximumf %166, %173 : vector<21x128xf32>
    %c0_76 = arith.constant 0 : index
    %c0_77 = arith.constant 0 : index
    %175 = vector.load %arg9[%c0_76, %c0_77] : memref<8x21xf32, #tpu.memory_space<vmem>>, vector<8x21xf32>
    %cst_78 = arith.constant dense<0.000000e+00> : vector<8x128xf32>
    %176 = tpu.matmul %175, %174, %cst_78 {dimension_numbers = #tpu.dot_dimension_numbers<[1], [0], [0], [1], [0, 0, 1, 1], [], []>} : vector<8x21xf32>, vector<21x128xf32>, vector<8x128xf32> -> vector<8x128xf32>
    %c0_79 = arith.constant 0 : index
    %c0_80 = arith.constant 0 : index
    %177 = vector.load %arg10[%c0_79, %c0_80] : memref<8x1xf32, #tpu.memory_space<vmem>>, vector<8x1xf32>
    %178 = vector.broadcast %177 : vector<8x1xf32> to vector<8x128xf32>
    %179 = arith.addf %176, %178 : vector<8x128xf32>
    %cst_81 = arith.constant 0.000000e+00 : f32
    %180 = vector.broadcast %cst_81 : f32 to vector<8x128xf32>
    %181 = arith.maximumf %179, %180 : vector<8x128xf32>
    %c24 = arith.constant 24 : index
    %c0_82 = arith.constant 0 : index
    %182 = vector.load %arg11[%c24, %c0_82] : memref<32x128xf32, #tpu.memory_space<vmem>>, vector<8x128xf32>
    tpu.vector_store %arg11[%c24, %c0_82], %181 {strides = array<i32>} : memref<32x128xf32, #tpu.memory_space<vmem>>, vector<8x128xf32>,
    %183 = arith.mulf %181, %181 : vector<8x128xf32>
    %184 = tpu.concatenate %181, %183 in 0 : vector<8x128xf32>, vector<8x128xf32> -> vector<16x128xf32>
    %cst_83 = arith.constant dense<0.000000e+00> : vector<16x1xf32>
    %185 = tpu.matmul %184, %1, %cst_83 {dimension_numbers = #tpu.dot_dimension_numbers<[1], [0], [0], [1], [0, 0, 1, 1], [], []>} : vector<16x128xf32>, vector<128x1xf32>, vector<16x1xf32> -> vector<16x1xf32>
    %186 = vector.extract_strided_slice %185 {offsets = [0, 0], sizes = [8, 1], strides = [1, 1]} : vector<16x1xf32> to vector<8x1xf32>
    %c0_84 = arith.constant 0 : index
    %c24_85 = arith.constant 24 : index
    %c0_86 = arith.constant 0 : index
    %187 = vector.load %arg12[%c0_84, %c24_85, %c0_86] : memref<1x32x2xf32, #tpu.memory_space<vmem>>, vector<1x8x1xf32>
    %188 = vector.shape_cast %187 : vector<1x8x1xf32> to vector<8x1xf32>
    %189 = vector.shape_cast %186 : vector<8x1xf32> to vector<1x8x1xf32>
    tpu.vector_store %arg12[%c0_84, %c24_85, %c0_86], %189 {strides = array<i32>} : memref<1x32x2xf32, #tpu.memory_space<vmem>>, vector<1x8x1xf32>,
    %190 = vector.extract_strided_slice %185 {offsets = [8, 0], sizes = [8, 1], strides = [1, 1]} : vector<16x1xf32> to vector<8x1xf32>
    %c0_87 = arith.constant 0 : index
    %c24_88 = arith.constant 24 : index
    %c1_89 = arith.constant 1 : index
    %191 = vector.load %arg12[%c0_87, %c24_88, %c1_89] : memref<1x32x2xf32, #tpu.memory_space<vmem>>, vector<1x8x1xf32>
    %192 = vector.shape_cast %191 : vector<1x8x1xf32> to vector<8x1xf32>
    %193 = vector.shape_cast %190 : vector<8x1xf32> to vector<1x8x1xf32>
    tpu.vector_store %arg12[%c0_87, %c24_88, %c1_89], %193 {strides = array<i32>} : memref<1x32x2xf32, #tpu.memory_space<vmem>>, vector<1x8x1xf32>,
    return
  }
  func.func @transform_0(%arg0: i32) -> (i32, i32) {
    %c0_i32 = arith.constant 0 : i32
    %c0_i32_0 = arith.constant 0 : i32
    return %c0_i32, %arg0 : i32, i32
  }
  func.func @transform_1(%arg0: i32) -> (i32, i32) {
    %c0_i32 = arith.constant 0 : i32
    %c0_i32_0 = arith.constant 0 : i32
    return %arg0, %c0_i32 : i32, i32
  }
  func.func @transform_2(%arg0: i32) -> (i32, i32) {
    %c0_i32 = arith.constant 0 : i32
    %c0_i32_0 = arith.constant 0 : i32
    %c0_i32_1 = arith.constant 0 : i32
    return %c0_i32, %c0_i32_0 : i32, i32
  }
  func.func @transform_3(%arg0: i32) -> (i32, i32) {
    %c0_i32 = arith.constant 0 : i32
    %c0_i32_0 = arith.constant 0 : i32
    %c0_i32_1 = arith.constant 0 : i32
    return %c0_i32, %c0_i32_0 : i32, i32
  }
  func.func @transform_4(%arg0: i32) -> (i32, i32) {
    %c0_i32 = arith.constant 0 : i32
    %c0_i32_0 = arith.constant 0 : i32
    %c0_i32_1 = arith.constant 0 : i32
    return %c0_i32, %c0_i32_0 : i32, i32
  }
  func.func @transform_5(%arg0: i32) -> (i32, i32) {
    %c0_i32 = arith.constant 0 : i32
    %c0_i32_0 = arith.constant 0 : i32
    %c0_i32_1 = arith.constant 0 : i32
    return %c0_i32, %c0_i32_0 : i32, i32
  }
  func.func @transform_6(%arg0: i32) -> (i32, i32) {
    %c0_i32 = arith.constant 0 : i32
    %c0_i32_0 = arith.constant 0 : i32
    %c0_i32_1 = arith.constant 0 : i32
    return %c0_i32, %c0_i32_0 : i32, i32
  }
  func.func @transform_7(%arg0: i32) -> (i32, i32) {
    %c0_i32 = arith.constant 0 : i32
    %c0_i32_0 = arith.constant 0 : i32
    %c0_i32_1 = arith.constant 0 : i32
    return %c0_i32, %c0_i32_0 : i32, i32
  }
  func.func @transform_8(%arg0: i32) -> (i32, i32) {
    %c0_i32 = arith.constant 0 : i32
    %c0_i32_0 = arith.constant 0 : i32
    %c0_i32_1 = arith.constant 0 : i32
    return %c0_i32, %c0_i32_0 : i32, i32
  }
  func.func @transform_9(%arg0: i32) -> (i32, i32) {
    %c0_i32 = arith.constant 0 : i32
    %c0_i32_0 = arith.constant 0 : i32
    %c0_i32_1 = arith.constant 0 : i32
    return %c0_i32, %c0_i32_0 : i32, i32
  }
  func.func @transform_10(%arg0: i32) -> (i32, i32) {
    %c0_i32 = arith.constant 0 : i32
    %c0_i32_0 = arith.constant 0 : i32
    return %c0_i32, %arg0 : i32, i32
  }
  func.func @transform_11(%arg0: i32) -> (i32, i32, i32) {
    %c0_i32 = arith.constant 0 : i32
    %c0_i32_0 = arith.constant 0 : i32
    %c0_i32_1 = arith.constant 0 : i32
    return %arg0, %c0_i32, %c0_i32_0 : i32, i32, i32
  }
}

</mosaic_0001>

<bundles_post_ra>
// kernel: inception_block.3
= control target key start
LH: loop header
LB: loop body
LE: loop exit
PB: predicated region body
PF: predicated region fallthrough
CT: control target
= control target key end

     0   :  { %v85_v0 = vmov 0   ;;  %s154_s1 = inlined_call_operand.vmem [shape: f32[32,1], index: 1, kind: input, shape index: {}]   ;;  %s155_s2 = inlined_call_operand.vmem [shape: f32[32,1], index: 2, kind: input, shape index: {}]   ;;  %s156_s0 = inlined_call_operand.vmem [shape: f32[32,128], index: 0, kind: input, shape index: {}]   ;;  %s157_s3 = inlined_call_operand.vmem [shape: f32[32,128], index: 3, kind: output, shape index: {}]  }
   0x1   :  { %84 = vset.pattern.permute.xlu1 %v85_v0  ;;  %83 = vset.pattern.permute.xlu0 %v85_v0  ;;  %v20_v1 = vld [vmem:[%s154_s1 + $0x10] sm:$0xff]  ;;  %v18_v2 = vld [vmem:[%s154_s1] sm:$0xff]  ;;  %v21_v3 = vld [vmem:[%s154_s1 + $0x18] sm:$0xff] }
   0x2   :  { %34 = vperm.xlu1 %84, %v20_v1   ;;  %24 = vperm.xlu0 %83, %v18_v2   ;;  %v19_v4 = vld [vmem:[%s154_s1 + $0x8] sm:$0xff]  ;;  %v46_v6 = vld [vmem:[%s155_s2] sm:$0xff]  ;;  %v49_v7 = vld [vmem:[%s155_s2 + $0x18] sm:$0xff] }
   0x3   :  { %v47_v5 = vld [vmem:[%s155_s2 + $0x8] sm:$0xff]  ;;  %v48_v8 = vld [vmem:[%s155_s2 + $0x10] sm:$0xff]  ;;  %v14_v11 = vld [vmem:[%s156_s0] sm:$0xff] }
   0x4   :  { %v15_v14 = vld [vmem:[%s156_s0 + $0x8] sm:$0xff]  ;;  %v16_v17 = vld [vmem:[%s156_s0 + $0x10] sm:$0xff]  ;;  %v17_v18 = vld [vmem:[%s156_s0 + $0x18] sm:$0xff] }
   0x6   :  { %39 = vperm.xlu1 %84, %v21_v3   ;;  %29 = vperm.xlu0 %83, %v19_v4  }
   0xa   :  { %57 = vperm.xlu1 %84, %v47_v5   ;;  %52 = vperm.xlu0 %83, %v46_v6  }
   0xe   :  { %67 = vperm.xlu1 %84, %v49_v7   ;;  %62 = vperm.xlu0 %83, %v48_v8  }
  0x81   :  { %v35_v9 = vpop.permute.xlu1 %34  ;;  %v25_v10 = vpop.permute.xlu0 %24 }
  0x82   :  { %v42_v15 = vmul.f32 %v25_v10, %v14_v11  ;;  %v44_v23 = vmul.f32 %v35_v9, %v16_v17 }
  0x85   :  { %v40_v12 = vpop.permute.xlu1 %39  ;;  %v30_v13 = vpop.permute.xlu0 %29 }
  0x86   :  { %v43_v16 = vmul.f32 %v30_v13, %v15_v14  ;;  %v45_v24 = vmul.f32 %v40_v12, %v17_v18 }
  0x89   :  { %v58_v19 = vpop.permute.xlu1 %57  ;;  %v53_v20 = vpop.permute.xlu0 %52 }
  0x8a   :  { %v71_v21 = vadd.f32 %v58_v19, %v43_v16  ;;  %v70_v22 = vadd.f32 %v53_v20, %v42_v15 }
  0x8c   :  { %75 = vst [vmem:[%s157_s3 + $0x8] sm:$0xff] %v71_v21  ;;  %74 = vst [vmem:[%s157_s3] sm:$0xff] %v70_v22 }
  0x8d   :  { %v68_v25 = vpop.permute.xlu1 %67  ;;  %v63_v26 = vpop.permute.xlu0 %62 }
  0x8e   :  { %v73_v27 = vadd.f32 %v68_v25, %v45_v24  ;;  %v72_v28 = vadd.f32 %v63_v26, %v44_v23 }
  0x90   :  { %77 = vst [vmem:[%s157_s3 + $0x18] sm:$0xff] %v73_v27  ;;  %76 = vst [vmem:[%s157_s3 + $0x10] sm:$0xff] %v72_v28 }

// kernel: inception_block.2
= control target key start
LH: loop header
LB: loop body
LE: loop exit
PB: predicated region body
PF: predicated region fallthrough
CT: control target
= control target key end

     0   :  { %v1334_v0 = vmov 0.0|0.0   ;;  %vm1335_vm0 = vmmov 0   ;;  %v1336_v3 = vmov 0.0   ;;  %v1337_v5 = vmov 0   ;;  %s1338_s18 = smov 127   ;;  %s1342_s12 = smov 126   ;;  %s1725_s0 = inlined_call_operand.vmem [shape: f32[21,128], index: 0, kind: input, shape index: {}]   ;;  %s1726_s3 = inlined_call_operand.vmem [shape: f32[24,1], index: 3, kind: input, shape index: {}]   ;;  %s1727_s2 = inlined_call_operand.vmem [shape: f32[24,21], index: 2, kind: input, shape index: {}]   ;;  %s1728_s1 = inlined_call_operand.vmem [shape: f32[128,1], index: 1, kind: input, shape index: {}]   ;;  %s1729_s5 = inlined_call_operand.vmem [shape: f32[8,1], index: 5, kind: input, shape index: {}]   ;;  %s1730_s4 = inlined_call_operand.vmem [shape: f32[8,24], index: 4, kind: input, shape index: {}]   ;;  %s1731_s10 = inlined_call_operand.vmem [shape: f32[32,128], index: 10, kind: output, shape index: {0}]   ;;  %s1732_s7 = inlined_call_operand.vmem [shape: f32[8,1], index: 7, kind: input, shape index: {}]   ;;  %s1733_s9 = inlined_call_operand.vmem [shape: f32[8,1], index: 9, kind: input, shape index: {}]   ;;  %s1734_s6 = inlined_call_operand.vmem [shape: f32[8,40], index: 6, kind: input, shape index: {}]   ;;  %s1735_s8 = inlined_call_operand.vmem [shape: f32[8,21], index: 8, kind: input, shape index: {}]   ;;  %s1736_s11 = inlined_call_operand.vmem [shape: f32[1,32,2], index: 11, kind: output, shape index: {1}]  }
   0x1   :  { %1167 = vmatprep.subr.bf16.mxu1 %v1334_v0  ;;  %v1407_v1 = vld [vmem:[%s1725_s0] sm:$0xff]  ;;  %v1412_v2 = vld [vmem:[%s1725_s0 + $0x8] sm:$0xff]  ;;  %987 = vmatprep.mubr.msk.f32.mxu1 %vm1335_vm0, %v1336_v3  ;;  %v1428_v7 = vld [vmem:[%s1725_s0 + $0x10] sm:$0x1f]  ;;  %vm117_vm1 = vcmask 1044480   ;;  %vm107_vm2 = vcmask 171008   ;;  %v56_v48 = vlaneseq }
   0x2   :  { %v1168_v4 = vpack.c.bf16 %v1412_v2, %v1407_v1  ;;  %1322 = vset.pattern.permute.xlu0 %v1337_v5  ;;  %v90_v6 = vld [vmem:[%s1726_s3 + $0x8] sm:$0xff]  ;;  %1323 = vset.pattern.permute.xlu1 %v1337_v5  ;;  %v86_v8 = vld [vmem:[%s1727_s2] sm:$0xff]  ;;  %v88_v10 = vld [vmem:[%s1727_s2 + $0x10] sm:$0xff]  ;;  %v1324_v44 = vpack.i.bf16 %v1412_v2, %v1407_v1  ;;  %vm281_vm3 = vcmask 7168   ;;  %vm1340_vm5 = vmmov 1   ;;  %s1341_s0 = smov 2  }
   0x3   :  { %99 = vperm.xlu0 %1322, %v90_v6   ;;  %1202 = vmatprep.subr.bf16.mxu0 %v1334_v0  ;;  %v87_v9 = vld [vmem:[%s1727_s2 + $0x8] sm:$0xff]  ;;  %v40_v11 = vld [vmem:[%s1728_s1] sm:$0xff]  ;;  %v42_v13 = vld [vmem:[%s1728_s1 + $0x10] sm:$0xff]  ;;  %s1339_s2 = smov 1   ;;  %v57_v49 = vand.u32 127, %v56_v48  ;;  %vm300_vm7 = vcmask 1039360  }
   0x4   :  { %1169 = vmatpush3.bf16.msra.mxu1 %v1168_v4  ;;  %1037 = vmatprep.mubr.msk.f32.mxu0 %vm1335_vm0, %v1336_v3  ;;  %v41_v12 = vld [vmem:[%s1728_s1 + $0x8] sm:$0xff]  ;;  %v43_v15 = vld [vmem:[%s1728_s1 + $0x18] sm:$0xff]  ;;  %v44_v17 = vld [vmem:[%s1728_s1 + $0x20] sm:$0xff]  ;;  %vm312_vm9 = vcmask 195584   ;;  %vm474_vm10 = vcmask 15360   ;;  %vm492_vm14 = vcmask 1031168  }
   0x5   :  { %985 = vmatprep.subr.mxu1 %v1336_v3  ;;  %v1457_v14 = vpack.c.bf16 %v41_v12, %v40_v11  ;;  %v1462_v16 = vpack.c.bf16 %v43_v15, %v42_v13  ;;  %v45_v18 = vld [vmem:[%s1728_s1 + $0x28] sm:$0xff]  ;;  %v46_v20 = vld [vmem:[%s1728_s1 + $0x30] sm:$0xff]  ;;  %v47_v21 = vld [vmem:[%s1728_s1 + $0x38] sm:$0xff]  ;;  %v1545_v50 = vand.u32 15, %v57_v49 }
   0x6   :  { %v1473_v19 = vpack.c.bf16 %v45_v18, %v44_v17  ;;  %v1484_v22 = vpack.c.bf16 %v47_v21, %v46_v20  ;;  %v48_v24 = vld [vmem:[%s1728_s1 + $0x40] sm:$0xff]  ;;  %v49_v25 = vld [vmem:[%s1728_s1 + $0x48] sm:$0xff]  ;;  %v50_v30 = vld [vmem:[%s1728_s1 + $0x50] sm:$0xff] }
   0x7   :  { %v1496_v27 = vpack.c.bf16 %v49_v25, %v48_v24  ;;  %v51_v31 = vld [vmem:[%s1728_s1 + $0x58] sm:$0xff]  ;;  %v52_v32 = vld [vmem:[%s1728_s1 + $0x60] sm:$0xff]  ;;  %v53_v36 = vld [vmem:[%s1728_s1 + $0x68] sm:$0xff]  ;;  %v1548_v51 = vadd.s32 4294967295, %v1545_v50  ;;  %v1553_v54 = vadd.s32 1, %v1545_v50  ;;  %v82_v25 = vadd.s32 2, %v1545_v50 }
   0x8   :  { %986 = vmatpush3.msk.msra.mxu1 %vm117_vm1, %v1428_v7  ;;  %v1509_v35 = vpack.c.bf16 %v51_v31, %v50_v30  ;;  %v1514_v37 = vpack.c.bf16 %v53_v36, %v52_v32  ;;  %v91_v39 = vld [vmem:[%s1726_s3 + $0x10] sm:$0xff]  ;;  %v89_v40 = vld [vmem:[%s1726_s3] sm:$0xff]  ;;  %v55_v43 = vld [vmem:[%s1728_s1 + $0x78] sm:$0xff] }
   0x9   :  { %988 = vmatmul.mubr.msk.f32.vlgmr.msra.gmra.mrb[0].mxu1 %vm107_vm2, %v86_v8  ;;  %1171 = vmatprep.subr.bf16.mxu1 %v1457_v14  ;;  %v54_v42 = vld [vmem:[%s1728_s1 + $0x70] sm:$0xff]  ;;  %v306_v47 = vld [vmem:[%s1729_s5] sm:$0xff]  ;;  %vm75_vm4 = vcmp.ge.s32.totalorder %v1548_v51, 0  ;;  %vm80_vm8 = vcmp.lt.s32.totalorder %v1553_v54, 16  ;;  %vm84_vm15 = vcmp.lt.s32.totalorder %v82_v25, 16 }
   0xa   :  { %990 = vmatprep.mubr.msk.f32.mxu1 %vm1335_vm0, %v1336_v3  ;;  %1173 = vmatpush3.bf16.msra.mxu1 %v1457_v14  ;;  %v1536_v45 = vpack.c.bf16 %v55_v43, %v54_v42  ;;  %vm1204_vm6 = vmpackc.low %vm1340_vm5, %vm75_vm4  ;;  %v305_v57 = vld [vmem:[%s1730_s4] sm:$0xff] }
   0xb   :  { %1175 = vmatprep.subr.bf16.mxu1 %v1462_v16  ;;  %v498_v6 = vld [vmem:[%s1732_s7] sm:$0xff]  ;;  %vm1244_vm13 = vmpackc.low %vm80_vm8, %vm1340_vm5 }
   0xc   :  { %v701_v8 = vld [vmem:[%s1733_s9] sm:$0xff] }
   0xd   :  { %991 = vmatmul.mubr.msk.f32.gmra.mrb[2].mxu1 %vm107_vm2, %v87_v9 }
   0xe   :  { %993 = vmatprep.mubr.msk.f32.mxu1 %vm1335_vm0, %v1336_v3  ;;  %1177 = vmatpush3.bf16.msra.mxu1 %v1462_v16 }
   0xf   :  { %1179 = vmatprep.subr.bf16.mxu1 %v1473_v19 }
  0x11   :  { %994 = vmatmul.mubr.msk.f32.gmra.mrb[4].mxu1 %vm107_vm2, %v88_v10  ;;  %v70_v10 = vadd.s32 4294967294, %v1545_v50 }
  0x12   :  { %1181 = vmatpush3.bf16.msra.mxu1 %v1473_v19 }
  0x13   :  { %1183 = vmatprep.subr.bf16.mxu1 %v1484_v22  ;;  %vm71_vm11 = vcmp.ge.s32.totalorder %v70_v10, 0 }
  0x14   :  { %vm1240_vm12 = vmpackc.low %vm75_vm4, %vm71_vm11 }
  0x16   :  { %1185 = vmatpush3.bf16.msra.mxu1 %v1484_v22 }
  0x17   :  { %1187 = vmatprep.subr.bf16.mxu1 %v1496_v27 }
  0x1a   :  { %1189 = vmatpush3.bf16.msra.mxu1 %v1496_v27 }
  0x1b   :  { %1191 = vmatprep.subr.bf16.mxu1 %v1509_v35 }
  0x1e   :  { %1193 = vmatpush3.bf16.msra.mxu1 %v1509_v35 }
  0x1f   :  { %1195 = vmatprep.subr.bf16.mxu1 %v1514_v37 }
  0x22   :  { %1197 = vmatpush3.bf16.msra.mxu1 %v1514_v37 }
  0x23   :  { %1199 = vmatprep.subr.bf16.mxu1 %v1536_v45 }
  0x26   :  { %1201 = vmatpush3.bf16.msra.mxu1 %v1536_v45 }
  0x27   :  { %1238 = vmatprep.subr.bf16.mxu1 %v1334_v0 }
  0x82   :  { %v100_v28 = vpop.permute.xlu0 %99 }
  0xdc   :  { %v1487_v23 = vpop.f32.mrb[0].mxu1 }
  0xdd   :  { %v989_v26 = vpop.f32.mrb[1].mxu1 }
  0xe0   :  { %v192_v29 = vpop.f32.mrb[2].mxu1 }
  0xe1   :  { %v193_v33 = vadd.f32 %v192_v29, %v100_v28  ;;  %v992_v34 = vpop.f32.mrb[3].mxu1  ;;  %v497_v29 = vld [vmem:[%s1734_s6] sm:$0xff] }
  0xe3   :  { %v202_v38 = vmax.f32 %v193_v33, 0.0 }
  0xe4   :  { %v197_v41 = vpop.f32.mrb[4].mxu1 }
  0xe5   :  { %297 = vrot.lane.b32.xlu1 %v202_v38, %s1338_s18  ;;  %290 = vrot.lane.b32.xlu0 %v202_v38, %s1339_s2  ;;  %v995_v46 = vpop.f32.mrb[5].mxu1 }
  0xe9   :  { %104 = vperm.xlu1 %1323, %v91_v39   ;;  %94 = vperm.xlu0 %1322, %v89_v40  }
  0xed   :  { %309 = vperm.xlu1 %1323, %v306_v47   ;;  %1325 = vrot.lane.b32.xlu0 %v1324_v44, %s1339_s2 }
 0x157   :  { %v291_v52 = vpop.permute.xlu0 %290  ;;  %v298_v56 = vpop.permute.xlu1 %297 }
 0x158   :  { %v293_v53 = vsel %vm281_vm3, 0.0, %v291_v52  ;;  %v301_v58 = vsel %vm300_vm7, %v298_v56, 0.0 }
 0x159   :  { %v1203_v55 = vpack.c.bf16 %v202_v38, %v293_v53 }
 0x15b   :  { %1205 = vmatpush3.bf16.msk.msra.mxu0 %vm1204_vm6, %v1203_v55  ;;  %vm504_vm6 = vcmask 326656  }
 0x15c   :  { %1035 = vmatprep.subr.mxu0 %v1336_v3 }
 0x15f   :  { %1036 = vmatpush3.msk.msra.mxu0 %vm80_vm8, %v301_v58 }
 0x160   :  { %1038 = vmatmul.mubr.msk.f32.vlgmr.msra.gmra.mrb[0].mxu0 %vm312_vm9, %v305_v57  ;;  %1207 = vmatprep.subr.bf16.mxu0 %v1457_v14 }
 0x161   :  { %1209 = vmatpush3.bf16.msra.mxu0 %v1457_v14 }
 0x162   :  { %1211 = vmatprep.subr.bf16.mxu0 %v1462_v16 }
 0x165   :  { %1213 = vmatpush3.bf16.msra.mxu0 %v1462_v16 }
 0x166   :  { %1215 = vmatprep.subr.bf16.mxu0 %v1473_v19 }
 0x168   :  { %v105_v59 = vpop.permute.xlu1 %104  ;;  %v95_v60 = vpop.permute.xlu0 %94 }
 0x169   :  { %v188_v61 = vadd.f32 %v1487_v23, %v95_v60  ;;  %v198_v62 = vadd.f32 %v197_v41, %v105_v59  ;;  %1217 = vmatpush3.bf16.msra.mxu0 %v1473_v19 }
 0x16a   :  { %1219 = vmatprep.subr.bf16.mxu0 %v1484_v22 }
 0x16b   :  { %v201_v63 = vmax.f32 %v188_v61, 0.0  ;;  %v203_v4 = vmax.f32 %v198_v62, 0.0 }
 0x16c   :  { %v1326_v9 = vpop.permute.xlu0 %1325  ;;  %v1603_v11 = vpop.permute.xlu1 %309 }
 0x16d   :  { %204 = vst [vmem:[%s1731_s10] sm:$0xff] %v201_v63  ;;  %v205_v5 = vmul.f32 %v201_v63, %v201_v63  ;;  %1028 = vmatprep.mubr.f32.mxu1 %v201_v63  ;;  %479 = vrot.lane.b32.xlu0 %v203_v4, %s1339_s2  ;;  %v1327_v31 = vunpack.i.l.bf16 %v1326_v9 }
 0x16e   :  { %471 = vrot.lane.b32.xlu1 %v203_v4, %s1341_s0  ;;  %1221 = vmatpush3.bf16.msra.mxu0 %v1484_v22 }
 0x16f   :  { %1029 = vmatmul.mubr.f32.vlgmr.msra.gmra.mrb[6].mxu1 %v205_v5  ;;  %1223 = vmatprep.subr.bf16.mxu0 %v1496_v27  ;;  %v673_v33 = vsel %vm281_vm3, 0.0, %v1327_v31 }
 0x170   :  { %1085 = vmatprep.mubr.msk.f32.mxu1 %vm1335_vm0, %v1336_v3  ;;  %v676_v39 = vsel %vm75_vm4, %v673_v33, -inf }
 0x171   :  { %484 = vrot.lane.b32.xlu0 %v203_v4, %s1338_s18  ;;  %v679_v43 = vmax.f32 %v1407_v1, %v676_v39 }
 0x172   :  { %1330 = vrot.lane.b32.xlu1 %v1324_v44, %s1338_s18  ;;  %1225 = vmatpush3.bf16.msra.mxu0 %v1496_v27 }
 0x173   :  { %1227 = vmatprep.subr.bf16.mxu0 %v1509_v35 }
 0x175   :  { %686 = vrot.lane.b32.xlu0 %v1428_v7, %s1338_s18 }
 0x176   :  { %668 = vrot.lane.b32.xlu1 %v1428_v7, %s1339_s2  ;;  %1229 = vmatpush3.bf16.msra.mxu0 %v1509_v35 }
 0x177   :  { %1231 = vmatprep.subr.bf16.mxu0 %v1514_v37 }
 0x179   :  { %501 = vperm.xlu0 %1322, %v498_v6  }
 0x17a   :  { %489 = vrot.lane.b32.xlu1 %v203_v4, %s1342_s12  ;;  %1233 = vmatpush3.bf16.msra.mxu0 %v1514_v37 }
 0x17b   :  { %1235 = vmatprep.subr.bf16.mxu0 %v1536_v45 }
 0x17e   :  { %704 = vperm.xlu1 %1323, %v701_v8   ;;  %1237 = vmatpush3.bf16.msra.mxu0 %v1536_v45 }
 0x17f   :  { %1278 = vmatprep.subr.bf16.mxu0 %v1334_v0 }
 0x1df   :  { %v480_v12 = vpop.permute.xlu0 %479 }
 0x1e0   :  { %v482_v13 = vsel %vm281_vm3, 0.0, %v480_v12  ;;  %v472_v15 = vpop.permute.xlu1 %471 }
 0x1e1   :  { %v475_v17 = vsel %vm474_vm10, 0.0, %v472_v15 }
 0x1e2   :  { %v1239_v18 = vpack.c.bf16 %v482_v13, %v475_v17 }
 0x1e3   :  { %v485_v20 = vpop.permute.xlu0 %484 }
 0x1e4   :  { %v487_v21 = vsel %vm300_vm7, %v485_v20, 0.0  ;;  %1241 = vmatpush3.bf16.msk.msra.mxu1 %vm1240_vm12, %v1239_v18  ;;  %v1331_v23 = vpop.permute.xlu1 %1330 }
 0x1e5   :  { %v1243_v24 = vpack.c.bf16 %v487_v21, %v203_v4  ;;  %1242 = vmatprep.subr.bf16.mxu1 %v1334_v0  ;;  %v1328_v0 = vunpack.i.h.bf16 %v1326_v9  ;;  %v1333_v34 = vunpack.i.h.bf16 %v1331_v23  ;;  %v1332_v36 = vunpack.i.l.bf16 %v1331_v23 }
 0x1e7   :  { %v674_v32 = vsel %vm281_vm3, 0.0, %v1328_v0  ;;  %v692_v40 = vsel %vm300_vm7, %v1333_v34, 0.0  ;;  %v691_v41 = vsel %vm300_vm7, %v1332_v36, 0.0  ;;  %v687_v50 = vpop.permute.xlu0 %686 }
 0x1e8   :  { %1245 = vmatpush3.bf16.msk.msra.mxu1 %vm1244_vm13, %v1243_v24  ;;  %v669_v26 = vpop.permute.xlu1 %668  ;;  %v677_v38 = vsel %vm75_vm4, %v674_v32, -inf  ;;  %v695_v46 = vsel %vm80_vm8, %v692_v40, -inf  ;;  %v694_v47 = vsel %vm80_vm8, %v691_v41, -inf  ;;  %v693_v1 = vsel %vm300_vm7, %v687_v50, 0.0 }
 0x1e9   :  { %1083 = vmatprep.subr.mxu1 %v1336_v3  ;;  %v680_v42 = vmax.f32 %v1412_v2, %v677_v38  ;;  %v675_v44 = vsel %vm281_vm3, 0.0, %v669_v26  ;;  %v697_v2 = vmax.f32 %v679_v43, %v694_v47  ;;  %v696_v58 = vsel %vm80_vm8, %v693_v1, -inf }
 0x1ea   :  { %v678_v49 = vsel %vm75_vm4, %v675_v44, -inf }
 0x1eb   :  { %v698_v55 = vmax.f32 %v680_v42, %v695_v46  ;;  %v681_v57 = vmax.f32 %v1428_v7, %v678_v49  ;;  %v700_v7 = vld [vmem:[%s1735_s8] sm:$0xff] }
 0x1ec   :  { %v490_v28 = vpop.permute.xlu1 %489 }
 0x1ed   :  { %v493_v30 = vsel %vm492_vm14, %v490_v28, 0.0  ;;  %v1279_v59 = vpack.c.bf16 %v698_v55, %v697_v2  ;;  %v699_v60 = vmax.f32 %v681_v57, %v696_v58 }
 0x1ee   :  { %1084 = vmatpush3.msk.msra.mxu1 %vm84_vm15, %v493_v30 }
 0x1ef   :  { %1086 = vmatmul.mubr.msk.f32.vlgmr.msra.gmra.mrb[8].mxu1 %vm504_vm6, %v497_v29  ;;  %1247 = vmatprep.subr.bf16.mxu1 %v1457_v14 }
 0x1f0   :  { %1249 = vmatpush3.bf16.msra.mxu1 %v1457_v14 }
 0x1f1   :  { %1251 = vmatprep.subr.bf16.mxu1 %v1462_v16 }
 0x1f4   :  { %1253 = vmatpush3.bf16.msra.mxu1 %v1462_v16 }
 0x1f5   :  { %1255 = vmatprep.subr.bf16.mxu1 %v1473_v19 }
 0x1f8   :  { %1257 = vmatpush3.bf16.msra.mxu1 %v1473_v19 }
 0x1f9   :  { %1259 = vmatprep.subr.bf16.mxu1 %v1484_v22 }
 0x1fc   :  { %1261 = vmatpush3.bf16.msra.mxu1 %v1484_v22 }
 0x1fd   :  { %1263 = vmatprep.subr.bf16.mxu1 %v1496_v27  ;;  %v705_v62 = vpop.permute.xlu1 %704 }
 0x200   :  { %1265 = vmatpush3.bf16.msra.mxu1 %v1496_v27 }
 0x201   :  { %1267 = vmatprep.subr.bf16.mxu1 %v1509_v35 }
 0x204   :  { %1269 = vmatpush3.bf16.msra.mxu1 %v1509_v35 }
 0x205   :  { %1271 = vmatprep.subr.bf16.mxu1 %v1514_v37 }
 0x208   :  { %1273 = vmatpush3.bf16.msra.mxu1 %v1514_v37 }
 0x209   :  { %1275 = vmatprep.subr.bf16.mxu1 %v1536_v45 }
 0x20c   :  { %1277 = vmatpush3.bf16.msra.mxu1 %v1536_v45 }
 0x233   :  { %v382_v48 = vpop.f32.mrb[0].mxu0 }
 0x234   :  { %v383_v52 = vadd.f32 %v382_v48, %v1603_v11  ;;  %v1039_v53 = vpop.f32.mrb[1].mxu0 }
 0x236   :  { %v386_v56 = vmax.f32 %v383_v52, 0.0 }
 0x238   :  { %387 = vst [vmem:[%s1731_s10 + $0x8] sm:$0xff] %v386_v56  ;;  %v388_v51 = vmul.f32 %v386_v56, %v386_v56  ;;  %1072 = vmatprep.mubr.f32.mxu0 %v386_v56 }
 0x23a   :  { %1073 = vmatmul.mubr.f32.vlgmr.msra.gmra.mrb[2].mxu0 %v388_v51 }
 0x23b   :  { %1280 = vmatpush3.bf16.msra.mxu0 %v1279_v59  ;;  %1129 = vmatprep.mubr.msk.f32.mxu0 %vm1335_vm0, %v1336_v3  ;;  %vm287_vm0 = vcmask 15368  }
 0x23c   :  { %1127 = vmatprep.subr.mxu0 %v1336_v3  ;;  %v502_v3 = vpop.permute.xlu0 %501 }
 0x23f   :  { %1128 = vmatpush3.msk.msra.mxu0 %vm117_vm1, %v699_v60 }
 0x240   :  { %1130 = vmatmul.mubr.msk.f32.vlgmr.msra.gmra.mrb[4].mxu0 %vm107_vm2, %v700_v7  ;;  %1282 = vmatprep.subr.bf16.mxu0 %v1457_v14 }
 0x241   :  { %1284 = vmatpush3.bf16.msra.mxu0 %v1457_v14 }
 0x242   :  { %v1030_v54 = vpop.f32.mrb[6].mxu1  ;;  %1286 = vmatprep.subr.bf16.mxu0 %v1462_v16 }
 0x243   :  { %284 = vrot.lane.b32.xlu0 %v1030_v54, %s1339_s2  ;;  %v272_v61 = vpop.f32.mrb[7].mxu1 }
 0x244   :  { %282 = vst.msk [vmem:[%s1736_s11] sm:$0xff] %vm281_vm3, %v272_v61 }
 0x245   :  { %1288 = vmatpush3.bf16.msra.mxu0 %v1462_v16 }
 0x246   :  { %1290 = vmatprep.subr.bf16.mxu0 %v1473_v19 }
 0x249   :  { %1292 = vmatpush3.bf16.msra.mxu0 %v1473_v19 }
 0x24a   :  { %1294 = vmatprep.subr.bf16.mxu0 %v1484_v22 }
 0x24d   :  { %1296 = vmatpush3.bf16.msra.mxu0 %v1484_v22 }
 0x24e   :  { %1298 = vmatprep.subr.bf16.mxu0 %v1496_v27 }
 0x251   :  { %1300 = vmatpush3.bf16.msra.mxu0 %v1496_v27 }
 0x252   :  { %1302 = vmatprep.subr.bf16.mxu0 %v1509_v35 }
 0x255   :  { %1304 = vmatpush3.bf16.msra.mxu0 %v1509_v35 }
 0x256   :  { %1306 = vmatprep.subr.bf16.mxu0 %v1514_v37 }
 0x259   :  { %1308 = vmatpush3.bf16.msra.mxu0 %v1514_v37 }
 0x25a   :  { %1310 = vmatprep.subr.bf16.mxu0 %v1536_v45 }
 0x25d   :  { %1312 = vmatpush3.bf16.msra.mxu0 %v1536_v45 }
 0x2b5   :  { %v285_v14 = vpop.permute.xlu0 %284 }
 0x2b6   :  { %288 = vst.msk [vmem:[%s1736_s11] sm:$0xff] %vm287_vm0, %v285_v14 }
 0x2c2   :  { %v574_v16 = vpop.f32.mrb[8].mxu1 }
 0x2c3   :  { %v575_v19 = vadd.f32 %v574_v16, %v502_v3  ;;  %v1087_v22 = vpop.f32.mrb[9].mxu1 }
 0x2c5   :  { %v578_v27 = vmax.f32 %v575_v19, 0.0 }
 0x2c7   :  { %579 = vst [vmem:[%s1731_s10 + $0x10] sm:$0xff] %v578_v27  ;;  %v580_v35 = vmul.f32 %v578_v27, %v578_v27  ;;  %1120 = vmatprep.mubr.f32.mxu1 %v578_v27 }
 0x2c9   :  { %1121 = vmatmul.mubr.f32.vlgmr.msra.gmra.mrb[10].mxu1 %v580_v35 }
 0x30d   :  { %v1074_v37 = vpop.f32.mrb[2].mxu0 }
 0x30e   :  { %v455_v45 = vpop.f32.mrb[3].mxu0  ;;  %466 = vrot.lane.b32.xlu1 %v1074_v37, %s1339_s2 }
 0x30f   :  { %464 = vst.msk [vmem:[%s1736_s11 + $0x8] sm:$0xff] %vm281_vm3, %v455_v45 }
 0x313   :  { %v779_v63 = vpop.f32.mrb[4].mxu0 }
 0x314   :  { %v780_v4 = vadd.f32 %v779_v63, %v705_v62  ;;  %v1131_v5 = vpop.f32.mrb[5].mxu0 }
 0x316   :  { %v783_v6 = vmax.f32 %v780_v4, 0.0 }
 0x318   :  { %784 = vst [vmem:[%s1731_s10 + $0x18] sm:$0xff] %v783_v6  ;;  %v785_v8 = vmul.f32 %v783_v6, %v783_v6  ;;  %1164 = vmatprep.mubr.f32.mxu0 %v783_v6 }
 0x31a   :  { %1165 = vmatmul.mubr.f32.vlgmr.msra.gmra.mrb[6].mxu0 %v785_v8 }
 0x380   :  { %v467_v9 = vpop.permute.xlu1 %466 }
 0x381   :  { %469 = vst.msk [vmem:[%s1736_s11 + $0x8] sm:$0xff] %vm287_vm0, %v467_v9 }
 0x39c   :  { %v1122_v10 = vpop.f32.mrb[10].mxu1 }
 0x39d   :  { %658 = vrot.lane.b32.xlu0 %v1122_v10, %s1339_s2  ;;  %v647_v11 = vpop.f32.mrb[11].mxu1 }
 0x39e   :  { %656 = vst.msk [vmem:[%s1736_s11 + $0x10] sm:$0xff] %vm281_vm3, %v647_v11 }
 0x3ed   :  { %v1166_v12 = vpop.f32.mrb[6].mxu0 }
 0x3ee   :  { %863 = vrot.lane.b32.xlu1 %v1166_v12, %s1339_s2  ;;  %v852_v13 = vpop.f32.mrb[7].mxu0 }
 0x3ef   :  { %861 = vst.msk [vmem:[%s1736_s11 + $0x18] sm:$0xff] %vm281_vm3, %v852_v13 }
 0x40f   :  { %v659_v15 = vpop.permute.xlu0 %658 }
 0x410   :  { %661 = vst.msk [vmem:[%s1736_s11 + $0x10] sm:$0xff] %vm287_vm0, %v659_v15 }
 0x460   :  { %v864_v17 = vpop.permute.xlu1 %863 }
 0x461   :  { %866 = vst.msk [vmem:[%s1736_s11 + $0x18] sm:$0xff] %vm287_vm0, %v864_v17 }

</bundles_post_ra>
